<compile_context>
chip_gen: v7x
topology: tpu7x:2x2x1
jax: 0.10.0
libtpu: 0.0.40
codegen_flags: <defaults>
</compile_context>

<pallas_src>
import functools

import jax
import jax.numpy as jnp
from jax.experimental import pallas as pl
from jax.experimental.pallas import tpu as pltpu

_NEG = -1e30  # additive mask value for non-edges


def _round_up(x, m):
    return (x + m - 1) // m * m


def _gat_kernel(el_ref, fdst_ref, bias_ref, ar_ref, fsrc_ref, out_ref, *,
                negative_slope, activation):
    el = el_ref[...]                      # (1, N_src_p)       f32, resident
    fdst = fdst_ref[...]                  # (tile_m, d_p)      f32 dst tile
    bias = bias_ref[...]                  # (tile_m, N_src_p)  bf16 additive mask
    ar = ar_ref[...]                      # (1, d_p)           f32, resident
    fsrc = fsrc_ref[...]                  # (N_src_p, d_p)     bf16, resident

    # er via VPU multiply + lane reduce (no under-filled N=1 MXU matmul).
    er = jnp.sum(fdst * ar, axis=1, keepdims=True)            # (tile_m, 1)

    e = el + er                                                # (tile_m, N_src_p)
    e = jnp.maximum(e, negative_slope * e)                     # LeakyReLU
    e = e + bias.astype(jnp.float32)                           # mask non-edges

    # Numerically stable masked edge_softmax *numerator*; masked entries
    # underflow to exactly 0 after the exp, so no second select is needed.
    row_max = jnp.max(e, axis=1, keepdims=True)                # (tile_m, 1)
    p = jnp.exp(e - row_max)                                   # (tile_m, N_src_p)
    row_sum = jnp.sum(p, axis=1, keepdims=True)                # (tile_m, 1)

    # bf16 MXU operands, f32 accumulation.
    msg = jnp.dot(p.astype(jnp.bfloat16), fsrc,
                  preferred_element_type=jnp.float32)          # (tile_m, d_p)

    # Isolated dst rows (no in-edges): row_max stays ~-1e30 -> output 0
    # (instead of a spurious uniform average of feat_src).
    inv = jnp.where(row_max > -1e29, 1.0 / row_sum, 0.0)       # O(tile_m) divides
    out = msg * inv

    if activation == "elu":
        out = jnp.where(out > 0, out, jnp.exp(out) - 1.0)

    out_ref[...] = out.astype(out_ref.dtype)


def heco_gat_conv(feat_src, feat_dst, adj, attn_l, attn_r, *,
                  negative_slope=0.01, activation=None, tile_m=128):
    """Forward pass of HeCoGATConv with a dense bipartite adjacency mask.

    feat_src: (N_src, d), feat_dst: (N_dst, d), adj: (N_dst, N_src) in {0,1},
    attn_l / attn_r: (1, d).  Returns (N_dst, d) float32.
    """
    N_src, d = feat_src.shape
    N_dst = feat_dst.shape[0]

    f32, bf16 = jnp.float32, jnp.bfloat16

    d_p = _round_up(d, 128)                 # lane-dense feature dim
    N_src_p = _round_up(N_src, 128)         # lane-dense source axis
    tile_m = max(8, _round_up(min(tile_m, max(N_dst, 8)), 8))
    N_dst_p = _round_up(N_dst, tile_m)

    # Grid-invariant per-source logits el = <feat_src, attn_l>, lane-dense.
    el = jnp.sum(feat_src.astype(f32) * attn_l.astype(f32), axis=-1)   # (N_src,)
    el_p = jnp.pad(el, (0, N_src_p - N_src)).reshape(1, N_src_p)

    # Resident source features in bf16 (MXU operand); zero padding is inert.
    fsrc_p = jnp.pad(feat_src.astype(bf16),
                     ((0, N_src_p - N_src), (0, d_p - d)))

    fdst_p = jnp.pad(feat_dst.astype(f32),
                     ((0, N_dst_p - N_dst), (0, d_p - d)))

    # Additive attention bias, built directly in bf16 (no f32 adjacency copy):
    # 0 on edges, -1e30 elsewhere; padded rows/cols are masked out too.
    bias = jnp.where(adj > 0, 0.0, _NEG).astype(bf16)
    bias_p = jnp.pad(bias, ((0, N_dst_p - N_dst), (0, N_src_p - N_src)),
                     constant_values=_NEG)

    ar_p = jnp.pad(attn_r.astype(f32), ((0, 0), (0, d_p - d)))

    kernel = functools.partial(_gat_kernel,
                               negative_slope=float(negative_slope),
                               activation=activation)

    # Shape-derived VMEM budget: double-buffered tiled streams, resident
    # operands, plus ~3 full-slab f32 temporaries (e / p) the compiler holds.
    tile_bytes = (
        2 * tile_m * N_src_p * 2          # bias tile (bf16), double-buffered
        + 2 * tile_m * d_p * 4            # fdst tile
        + 2 * tile_m * d_p * 4            # out tile
        + 2 * N_src_p * d_p * 2           # resident fsrc (bf16)
        + 2 * N_src_p * 4                 # resident el
        + 2 * d_p * 4                     # resident attn_r
        + 3 * tile_m * N_src_p * 4        # e / p slab temporaries
    )
    vmem_limit = int(min(max(tile_bytes * 5 // 4, 16 * 1024 * 1024),
                         64 * 1024 * 1024))

    out = pl.pallas_call(
        kernel,
        out_shape=jax.ShapeDtypeStruct((N_dst_p, d_p), f32),
        grid=(N_dst_p // tile_m,),
        in_specs=[
            pl.BlockSpec((1, N_src_p), lambda i: (0, 0)),        # el (resident)
            pl.BlockSpec((tile_m, d_p), lambda i: (i, 0)),       # feat_dst tile
            pl.BlockSpec((tile_m, N_src_p), lambda i: (i, 0)),   # adj bias tile
            pl.BlockSpec((1, d_p), lambda i: (0, 0)),            # attn_r (resident)
            pl.BlockSpec((N_src_p, d_p), lambda i: (0, 0)),      # feat_src (resident)
        ],
        out_specs=pl.BlockSpec((tile_m, d_p), lambda i: (i, 0)),
        compiler_params=pltpu.CompilerParams(
            dimension_semantics=("parallel",),
            vmem_limit_bytes=vmem_limit),
    )(el_p, fdst_p, bias_p, ar_p, fsrc_p)

    return out[:N_dst, :d]


def _reference(feat_src, feat_dst, adj, attn_l, attn_r, negative_slope):
    """Pure-JAX reference mirroring the PyTorch/DGL forward."""
    el = (feat_src * attn_l).sum(-1)                      # (N_src,)
    er = (feat_dst * attn_r).sum(-1)                      # (N_dst,)
    e = el[None, :] + er[:, None]                         # (N_dst, N_src)
    e = jnp.where(e >= 0, e, negative_slope * e)
    e = jnp.where(adj > 0, e, -jnp.inf)
    a = jax.nn.softmax(e, axis=1)
    a = jnp.where(adj > 0, a, 0.0)
    return a @ feat_src


if __name__ == "__main__":
    N_src, N_dst, d = 24, 16, 32
    negative_slope = 0.01

    key = jax.random.PRNGKey(0)
    k_fs, k_fd, k_adj, k_al, k_ar = jax.random.split(key, 5)

    feat_src = jax.random.normal(k_fs, (N_src, d), dtype=jnp.float32)
    feat_dst = jax.random.normal(k_fd, (N_dst, d), dtype=jnp.float32)

    # random bipartite adjacency; guarantee every dst has at least one in-edge
    adj = (jax.random.uniform(k_adj, (N_dst, N_src)) < 0.25).astype(jnp.float32)
    adj = adj.at[jnp.arange(N_dst), jnp.arange(N_dst) % N_src].set(1.0)

    # Xavier-normal attn vectors with gain = calculate_gain('relu') = sqrt(2)
    gain = jnp.sqrt(2.0)
    std = gain * jnp.sqrt(2.0 / (1 + d))
    attn_l = std * jax.random.normal(k_al, (1, d), dtype=jnp.float32)
    attn_r = std * jax.random.normal(k_ar, (1, d), dtype=jnp.float32)

    out = heco_gat_conv(feat_src, feat_dst, adj, attn_l, attn_r,
                        negative_slope=negative_slope,
                        activation=None, tile_m=8)       # grid of 2 row tiles
    jax.block_until_ready(out)

    ref = _reference(feat_src, feat_dst, adj, attn_l, attn_r, negative_slope)
    assert out.shape == (N_dst, d)
    assert bool(jnp.all(jnp.isfinite(out)))
    # bf16 MXU operands -> ~1e-2-level agreement with the f32 reference.
    assert jnp.allclose(out, ref, rtol=2e-2, atol=2e-2), \
        float(jnp.max(jnp.abs(out - ref)))

    print("KERNEL_OK")
</pallas_src>

<mosaic_0001>
module attributes {stable_mosaic.version = 11 : i64} {
  func.func @_gat_kernel(%arg0: i32, %arg1: memref<1x128xf32, #tpu.memory_space<vmem>>, %arg2: memref<8x128xf32, #tpu.memory_space<vmem>>, %arg3: memref<8x128xbf16, #tpu.memory_space<vmem>>, %arg4: memref<1x128xf32, #tpu.memory_space<vmem>>, %arg5: memref<128x128xbf16, #tpu.memory_space<vmem>>, %arg6: memref<8x128xf32, #tpu.memory_space<vmem>>) attributes {dimension_semantics = [#tpu.dimension_semantics<parallel>], iteration_bounds = array<i64: 2>, scalar_prefetch = 0 : i64, scratch_operands = 0 : i64, tpu.core_type = #tpu.core_type<tc>, window_params = [{pipeline_mode = #tpu.pipeline_mode<synchronous>, transform_indices = @transform_0, window_bounds = array<i64: 1, 128>}, {transform_indices = @transform_1, window_bounds = array<i64: 8, 128>}, {transform_indices = @transform_2, window_bounds = array<i64: 8, 128>}, {pipeline_mode = #tpu.pipeline_mode<synchronous>, transform_indices = @transform_3, window_bounds = array<i64: 1, 128>}, {pipeline_mode = #tpu.pipeline_mode<synchronous>, transform_indices = @transform_4, window_bounds = array<i64: 128, 128>}, {transform_indices = @transform_5, window_bounds = array<i64: 8, 128>}]} {
    %c0 = arith.constant 0 : index
    %c0_0 = arith.constant 0 : index
    %0 = vector.load %arg1[%c0, %c0_0] : memref<1x128xf32, #tpu.memory_space<vmem>>, vector<1x128xf32>
    %c0_1 = arith.constant 0 : index
    %c0_2 = arith.constant 0 : index
    %1 = vector.load %arg2[%c0_1, %c0_2] : memref<8x128xf32, #tpu.memory_space<vmem>>, vector<8x128xf32>
    %c0_3 = arith.constant 0 : index
    %c0_4 = arith.constant 0 : index
    %2 = vector.load %arg3[%c0_3, %c0_4] : memref<8x128xbf16, #tpu.memory_space<vmem>>, vector<8x128xbf16>
    %c0_5 = arith.constant 0 : index
    %c0_6 = arith.constant 0 : index
    %3 = vector.load %arg4[%c0_5, %c0_6] : memref<1x128xf32, #tpu.memory_space<vmem>>, vector<1x128xf32>
    %c0_7 = arith.constant 0 : index
    %c0_8 = arith.constant 0 : index
    %4 = vector.load %arg5[%c0_7, %c0_8] : memref<128x128xbf16, #tpu.memory_space<vmem>>, vector<128x128xbf16>
    %5 = vector.broadcast %3 : vector<1x128xf32> to vector<8x128xf32>
    %6 = arith.mulf %1, %5 : vector<8x128xf32>
    %cst = arith.constant dense<0.000000e+00> : vector<8xf32>
    %7 = vector.multi_reduction <add>, %6, %cst [1] : vector<8x128xf32> to vector<8xf32>
    %8 = vector.shape_cast %7 : vector<8xf32> to vector<8x1xf32>
    %9 = vector.broadcast %0 : vector<1x128xf32> to vector<8x128xf32>
    %10 = vector.broadcast %8 : vector<8x1xf32> to vector<8x128xf32>
    %11 = arith.addf %9, %10 : vector<8x128xf32>
    %cst_9 = arith.constant 0.00999999977 : f32
    %12 = vector.broadcast %cst_9 : f32 to vector<8x128xf32>
    %13 = arith.mulf %12, %11 : vector<8x128xf32>
    %14 = arith.maximumf %11, %13 : vector<8x128xf32>
    %15 = arith.extf %2 : vector<8x128xbf16> to vector<8x128xf32>
    %16 = arith.addf %14, %15 : vector<8x128xf32>
    %cst_10 = arith.constant dense<0xFF800000> : vector<8xf32>
    %17 = vector.multi_reduction <maximumf>, %16, %cst_10 [1] : vector<8x128xf32> to vector<8xf32>
    %18 = vector.shape_cast %17 : vector<8xf32> to vector<8x1xf32>
    %19 = vector.broadcast %18 : vector<8x1xf32> to vector<8x128xf32>
    %20 = arith.subf %16, %19 : vector<8x128xf32>
    %21 = math.exp %20 : vector<8x128xf32>
    %cst_11 = arith.constant dense<0.000000e+00> : vector<8xf32>
    %22 = vector.multi_reduction <add>, %21, %cst_11 [1] : vector<8x128xf32> to vector<8xf32>
    %23 = vector.shape_cast %22 : vector<8xf32> to vector<8x1xf32>
    %24 = arith.truncf %21 : vector<8x128xf32> to vector<8x128xbf16>
    %cst_12 = arith.constant dense<0.000000e+00> : vector<8x128xf32>
    %25 = tpu.matmul %24, %4, %cst_12 {dimension_numbers = #tpu.dot_dimension_numbers<[1], [0], [0], [1], [0, 0, 1, 1], [], []>} : vector<8x128xbf16>, vector<128x128xbf16>, vector<8x128xf32> -> vector<8x128xf32>
    %cst_13 = arith.constant -1.000000e+29 : f32
    %26 = vector.broadcast %cst_13 : f32 to vector<8x1xf32>
    %27 = arith.cmpf ogt, %18, %26 : vector<8x1xf32>
    %cst_14 = arith.constant 1.000000e+00 : f32
    %28 = vector.broadcast %cst_14 : f32 to vector<8x1xf32>
    %29 = arith.divf %28, %23 : vector<8x1xf32>
    %cst_15 = arith.constant 0.000000e+00 : f32
    %30 = vector.broadcast %cst_15 : f32 to vector<8x1xf32>
    %31 = arith.select %27, %29, %30 : vector<8x1xi1>, vector<8x1xf32>
    %32 = vector.broadcast %31 : vector<8x1xf32> to vector<8x128xf32>
    %33 = arith.mulf %25, %32 : vector<8x128xf32>
    %c0_16 = arith.constant 0 : index
    %c0_17 = arith.constant 0 : index
    %34 = vector.load %arg6[%c0_16, %c0_17] : memref<8x128xf32, #tpu.memory_space<vmem>>, vector<8x128xf32>
    tpu.vector_store %arg6[%c0_16, %c0_17], %33 {strides = array<i32>} : memref<8x128xf32, #tpu.memory_space<vmem>>, vector<8x128xf32>,
    return
  }
  func.func @transform_0(%arg0: i32) -> (i32, i32) {
    %c0_i32 = arith.constant 0 : i32
    %c0_i32_0 = arith.constant 0 : i32
    %c0_i32_1 = arith.constant 0 : i32
    return %c0_i32, %c0_i32_0 : i32, i32
  }
  func.func @transform_1(%arg0: i32) -> (i32, i32) {
    %c0_i32 = arith.constant 0 : i32
    %c0_i32_0 = arith.constant 0 : i32
    return %arg0, %c0_i32 : i32, i32
  }
  func.func @transform_2(%arg0: i32) -> (i32, i32) {
    %c0_i32 = arith.constant 0 : i32
    %c0_i32_0 = arith.constant 0 : i32
    return %arg0, %c0_i32 : i32, i32
  }
  func.func @transform_3(%arg0: i32) -> (i32, i32) {
    %c0_i32 = arith.constant 0 : i32
    %c0_i32_0 = arith.constant 0 : i32
    %c0_i32_1 = arith.constant 0 : i32
    return %c0_i32, %c0_i32_0 : i32, i32
  }
  func.func @transform_4(%arg0: i32) -> (i32, i32) {
    %c0_i32 = arith.constant 0 : i32
    %c0_i32_0 = arith.constant 0 : i32
    %c0_i32_1 = arith.constant 0 : i32
    return %c0_i32, %c0_i32_0 : i32, i32
  }
  func.func @transform_5(%arg0: i32) -> (i32, i32) {
    %c0_i32 = arith.constant 0 : i32
    %c0_i32_0 = arith.constant 0 : i32
    return %arg0, %c0_i32 : i32, i32
  }
}

</mosaic_0001>

<bundles_post_ra>
// kernel: tpu_custom_call.1
= control target key start
LH: loop header
LB: loop body
LE: loop exit
PB: predicated region body
PF: predicated region fallthrough
CT: control target
= control target key end

     0   :  { %s1219_s0 = inlined_call_operand.hbm [shape: f32[1,128], index: 0, kind: input, shape index: {}]   ;;  %s1220_s1 = inlined_call_operand.hbm [shape: f32[16,128], index: 1, kind: input, shape index: {}]   ;;  %s1221_s2 = inlined_call_operand.hbm [shape: bf16[16,128], index: 2, kind: input, shape index: {}]   ;;  %s1222_s3 = inlined_call_operand.vmem [shape: f32[1,128], index: 3, kind: input, shape index: {}]   ;;  %s1223_s4 = inlined_call_operand.hbm [shape: bf16[128,128], index: 4, kind: input, shape index: {}]   ;;  %s1224_s5 = inlined_call_operand.hbm [shape: f32[16,128], index: 5, kind: output, shape index: {}]  }
   0x1   :  { %1233 = sst [smem:[#allocation17_spill]] %s1219_s0 }
   0x2   :  { %1234 = sst [smem:[#allocation18_spill]] %s1220_s1 }
   0x3   :  { %10 = vsyncpa [#allocation3], 0 }
   0x4   :  { %11 = vsyncpa [#allocation6], 0 }
   0x5   :  { %13 = vsyncpa [#allocation6 + $0x1], 0 }
   0x6   :  { %14 = vsyncpa [#allocation9], 0 }
   0x7   :  { %15 = vsyncpa [#allocation4], 0 }
   0x8   :  { %17 = vsyncpa [#allocation4 + $0x1], 0  ;;  %s948_s18 = smov 0   ;;  %s950_s19 = smov 0  }
   0x9   :  { %s952_s20 = smov 0   ;;  %s954_s21 = smov 0  }
   0xa LB: > { %1235 = sst [smem:[#allocation15_spill]] %s903_s20  ;;  %s969_s22 = sadd.s32 1, %s907_s21   ;;  %s907_s21 = sphi %s954_s21, %s1261_s21   ;;  %s903_s20 = sphi %s952_s20, %s1258_s20   ;;  %s899_s19 = sphi %s950_s19, %s1260_s19   ;;  %s895_s18 = sphi %s948_s18, %s1259_s18  }
   0xb   : > { %s51_s23 = sadd.s32 1, %s903_s20  ;;  %s48_s24 = ssub.s32 %s907_s21, %s969_s22 }
   0xc   : > { %p58_p0 = scmp.ne.s32.totalorder %s903_s20, %s899_s19  ;;  %p49_p1 = scmp.eq.s32.totalorder %s48_s24, 0 }
   0xd   : > { %p59_p2 = scmp.eq.s32.totalorder %s907_s21, 0  ;;  %p663_p4 = scmp.lt.s32.totalorder %s907_s21, 2 }
   0xe   : > { %s980_s25 = scalar_select %p49_p1, %s903_s20, %s51_s23  }
   0xf   : > { %p60_p5 = por %p59_p2, %p58_p0  ;;  %s209_s26 = sand.u32 1, %s907_s21  }
  0x10   : > { %1236 = sst [smem:[#allocation16_spill]] %s980_s25  ;;  %s211_s27 = sand.u32 1, %s903_s20  }
  0x11   : > { %s576_s28 = sshll.u32 %s211_s27, 3  ;;  %s577_s29 = sshll.u32 %s907_s21, 7 }
  0x12   : > { %s1237_s1 = sld [smem:[#allocation18_spill]]  ;;  %s213_s8 = scalar_lea.vmem [#allocation5], %s576_s28 }
  0x13   : > { %s220_s9 = sshll.u32 %s213_s8, 4  ;;  %p993_p6 = pnand %p663_p4, %p60_p5  ;;  %s997_s9 = int_to_ptr.vmem [resolvable:$true] %s220_s9 }
  0x14   : > { %s999_s11 = sshll.u32 %s211_s27, 2  ;;  %s1001_s12 = scalar_lea.sflag [#allocation6], %s209_s26 }
  0x15   : > { %s1238_s10 = scalar_select %p993_p6, 1, 0 }
  0x16   : > { %p1227_p8 = pneg %p993_p6 }
  0x18   : > { %s991_s7 = scalar_lea.hbm %s1237_s1, %s577_s29  ;;  %s722_s16 = scalar_lea.hbm %s1237_s1, 256 }
  0x19   : > { %s717_s13 = scalar_lea.hbm %s991_s7, 128  ;;  %p723_p11 = scmp.lt.u32.totalorder %s991_s7, %s1237_s1 }
  0x1a   : > { %p718_p7 = scmp.ne.s32.totalorder %s991_s7, %s717_s13  ;;  %p724_p12 = scmp.lt.u32.totalorder %s722_s16, %s717_s13 }
  0x1b   : > { %p726_p1 = scmp.lt.u32.totalorder %s717_s13, %s991_s7 }
  0x1c   : > { %p720_p9 = pnand %p1227_p8, %p718_p7  ;;  %p725_p13 = por %p724_p12, %p723_p11 }
  0x1e   : > { %p721_p10 = pneg %p720_p9  ;;  %p727_p2 = por %p726_p1, %p725_p13 }
  0x20   : > { %p728_p4 = pnand %p727_p2, %p721_p10 }
  0x22   : > { %731 = shalt.err (!%p728_p4)
}
  0x23   : > { %s732_s24 = scalar_lea.vmem %s997_s9, 128  ;;  %s909_s26 = smov [#allocation5]  }
  0x24   : > { %p733_p5 = scmp.ne.s32.totalorder %s997_s9, %s732_s24  ;;  %s737_s27 = sshll.u32 %s909_s26, 4  ;;  %s738_s27 = int_to_ptr.vmem [resolvable:$false] %s737_s27 }
  0x25   : > { %s739_s28 = scalar_lea.vmem %s738_s27, 256  ;;  %p740_p3 = scmp.lt.s32.totalorder %s997_s9, %s738_s27 }
  0x26   : > { %p735_p7 = pnand %p733_p5, %p1227_p8  ;;  %p741_p11 = scmp.lt.s32.totalorder %s739_s28, %s732_s24 }
  0x28   : > { %p736_p9 = pneg %p735_p7  ;;  %p742_p12 = por %p741_p11, %p740_p3 }
  0x2a   : > { %p743_p13 = pnand %p742_p12, %p736_p9 }
  0x2c   : > { %746 = shalt.err (!%p743_p13)
}
  0x2d   : > { %653 = dma.hbm_to_vmem [thread:$0]  (!%p993_p6), %s991_s7, 128, %s997_s9, %s1001_s12  }
  0x2e   : > { %s1030_s29 = sadd.s32 4294967295, %s907_s21   ;;  %s571_s30 = sadd.s32 4294967294, %s907_s21  }
  0x2f   : > { %p64_p3 = scmp.ne.s32.totalorder %s899_s19, %s895_s18  ;;  %p1226_p10 = scmp.eq.s32.totalorder %s1030_s29, 0 }
  0x30   : > { %p156_p1 = scmp.eq.s32.totalorder %s1030_s29, 1  ;;  %p162_p2 = scmp.eq.s32.totalorder %s571_s30, 1 }
  0x31   : > { %p572_p4 = scmp.ge.s32.totalorder %s907_s21, 1  ;;  %p1040_p5 = por %p1226_p10, %p64_p3 }
  0x32   : > { %p1047_p7 = por %p156_p1, %p58_p0  ;;  %p1051_p9 = por %p162_p2, %p64_p3 }
  0x33   : > { %s1239_s6 = scalar_select %p1040_p5, 1, 0 }
  0x34   : > { %s1240_s7 = scalar_select %p1047_p7, 1, 0 }
  0x35   : > { %s1241_s8 = scalar_select %p1051_p9, 1, 0 }
  0x36   : > { %p169_p11 = scmp.lt.s32.totalorder %s907_s21, 3  ;;  %s910_s13 = smov [#allocation2]  }
  0x37   : > { %s182_s14 = sshll.u32 %s910_s13, 4  ;;  %s911_s15 = smov [#allocation8]   ;;  %s183_s14 = int_to_ptr.vmem [resolvable:$true] %s182_s14 }
  0x38   : > { %p1056_p12 = pnand %p572_p4, %p169_p11  ;;  %s195_s16 = sshll.u32 %s911_s15, 4  ;;  %s1062_s16 = int_to_ptr.vmem [resolvable:$true] %s195_s16 }
  0x39   : > { %s579_s23 = sshll.u32 %s907_s21, 6  ;;  %s1244_s0 = sld [smem:[#allocation17_spill]] }
  0x3a   : > { %s1242_s9 = scalar_select %p1056_p12, 1, 0 }
  0x3b   : > { %p643_p13 = pneg %p1056_p12  ;;  %s1074_s27 = scalar_lea.hbm %s1221_s2, %s579_s23 }
  0x3d   : > { %p1066_p0 = pnand %p643_p13, %p1226_p10 }
  0x3f   : > { %s747_s13 = scalar_lea.hbm %s1244_s0, 16  ;;  %p749_p1 = pneg %p1066_p0 }
  0x40   : > { %p748_p3 = scmp.ne.s32.totalorder %s1244_s0, %s747_s13  ;;  %p754_p11 = scmp.lt.u32.totalorder %s747_s13, %s1244_s0 }
  0x42   : > { %p750_p2 = pnand %p749_p1, %p748_p3 }
  0x44   : > { %p751_p4 = pneg %p750_p2 }
  0x46   : > { %p756_p13 = pnand %p754_p11, %p751_p4 }
  0x48   : > { %759 = shalt.err (!%p756_p13)
}
  0x49   : > { %s760_s23 = scalar_lea.vmem %s183_s14, 16  ;;  %s767_s1 = scalar_lea.vmem %s183_s14, 32 }
  0x4a   : > { %p761_p10 = scmp.ne.s32.totalorder %s183_s14, %s760_s23  ;;  %p768_p7 = scmp.lt.s32.totalorder %s183_s14, %s183_s14 }
  0x4b   : > { %p769_p5 = scmp.lt.s32.totalorder %s767_s1, %s760_s23 }
  0x4c   : > { %p763_p8 = pnand %p761_p10, %p749_p1 }
  0x4d   : > { %p770_p12 = por %p769_p5, %p768_p7 }
  0x4e   : > { %p764_p9 = pneg %p763_p8 }
  0x50   : > { %p771_p6 = pnand %p770_p12, %p764_p9 }
  0x52   : > { %774 = shalt.err (!%p771_p6)
}
  0x53   : > { %646 = dma.hbm_to_vmem [thread:$0]  (!%p1066_p0), %s1244_s0, 16, %s183_s14, [#allocation3]  }
  0x54   : > { %s775_s28 = scalar_lea.hbm %s1223_s4, 1024 }
  0x55   : > { %p776_p8 = scmp.ne.s32.totalorder %s1223_s4, %s775_s28  ;;  %p782_p6 = scmp.lt.u32.totalorder %s775_s28, %s1223_s4 }
  0x57   : > { %p778_p10 = pnand %p776_p8, %p749_p1 }
  0x59   : > { %p779_p5 = pneg %p778_p10 }
  0x5b   : > { %p784_p7 = pnand %p782_p6, %p779_p5 }
  0x5d   : > { %787 = shalt.err (!%p784_p7)
}
  0x5e   : > { %s788_s14 = scalar_lea.vmem %s1062_s16, 1024  ;;  %p796_p2 = scmp.lt.s32.totalorder %s1062_s16, %s1062_s16 }
  0x5f   : > { %p789_p9 = scmp.ne.s32.totalorder %s1062_s16, %s788_s14  ;;  %p797_p4 = scmp.lt.s32.totalorder %s788_s14, %s788_s14 }
  0x61   : > { %p791_p12 = pnand %p789_p9, %p749_p1  ;;  %p798_p11 = por %p797_p4, %p796_p2 }
  0x63   : > { %p792_p3 = pneg %p791_p12 }
  0x65   : > { %p799_p13 = pnand %p798_p11, %p792_p3 }
  0x67   : > { %802 = shalt.err (!%p799_p13)
}
  0x68   : > { %s912_s1 = smov 64   ;;  %s913_s24 = smov 4  }
  0x69   : > { %649 = dma.hbm_to_vmem [thread:$0]  (!%p1066_p0), %s1223_s4, 1024, %s1062_s16, [#allocation9], %s912_s1, %s912_s1, %s913_s24  }
  0x6a   : > { %s231_s26 = scalar_lea.vmem [#allocation7], %s999_s11  ;;  %s803_s30 = scalar_lea.hbm %s1074_s27, 64 }
  0x6b   : > { %s238_s28 = sshll.u32 %s231_s26, 4  ;;  %p804_p1 = scmp.ne.s32.totalorder %s1074_s27, %s803_s30  ;;  %s239_s28 = int_to_ptr.vmem [resolvable:$true] %s238_s28 }
  0x6c   : > { %p1245_p8 = scmp.ne.s32.totalorder %s1238_s10, 0  ;;  %s808_s23 = scalar_lea.hbm %s1221_s2, 128 }
  0x6d   : > { %p809_p7 = scmp.lt.u32.totalorder %s1074_s27, %s1221_s2  ;;  %p810_p9 = scmp.lt.u32.totalorder %s808_s23, %s803_s30 }
  0x6e   : > { %p1246_p10 = pneg %p1245_p8  ;;  %p812_p0 = scmp.lt.u32.totalorder %s803_s30, %s1074_s27 }
  0x6f   : > { %p811_p12 = por %p810_p9, %p809_p7 }
  0x70   : > { %p806_p5 = pnand %p804_p1, %p1246_p10 }
  0x71   : > { %p813_p3 = por %p812_p0, %p811_p12 }
  0x72   : > { %p807_p6 = pneg %p806_p5 }
  0x74   : > { %p814_p2 = pnand %p813_p3, %p807_p6 }
  0x76   : > { %817 = shalt.err (!%p814_p2)
}
  0x77   : > { %s818_s11 = scalar_lea.vmem %s239_s28, 64  ;;  %p1247_p11 = pmov %p1246_p10 }
  0x78   : > { %p819_p4 = scmp.ne.s32.totalorder %s239_s28, %s818_s11  ;;  %s914_s16 = smov [#allocation7]  }
  0x79   : > { %s823_s17 = sshll.u32 %s914_s16, 4  ;;  %s824_s17 = int_to_ptr.vmem [resolvable:$false] %s823_s17 }
  0x7a   : > { %p821_p13 = pnand %p819_p4, %p1247_p11  ;;  %s825_s1 = scalar_lea.vmem %s824_s17, 128 }
  0x7b   : > { %p826_p10 = scmp.lt.s32.totalorder %s239_s28, %s824_s17  ;;  %p827_p5 = scmp.lt.s32.totalorder %s825_s1, %s818_s11 }
  0x7c   : > { %p822_p1 = pneg %p821_p13 }
  0x7d   : > { %p828_p7 = por %p827_p5, %p826_p10 }
  0x7f   : > { %p829_p9 = pnand %p828_p7, %p822_p1 }
  0x81   : > { %832 = shalt.err (!%p829_p9)
}
  0x82   : > { %656 = dma.hbm_to_vmem [thread:$0]  (!%p1245_p8), %s1074_s27, 64, %s239_s28, %s1001_s12  }
  0x83   : > { %p1248_p6 = scmp.ne.s32.totalorder %s1242_s9, 0 }
  0x84   : > { %p1249_p12 = scmp.eq.s32.totalorder (!%p1248_p6), %s1030_s29, 0 }
  0x85   : > { %247 = sbr.rel (%p1248_p6) target bundleno = 689 (0x2b1), region = 40 }
  0x8c   : > { %878 = dma.done.wait (%p1249_p12), [#allocation3], 16   ;;  %p1250_p0 = pmov %p1249_p12 }
  0x8d   : > { %s253_s0 = sand.u32 1, %s1030_s29   ;;  %s1152_s24 = sand.u32 1, %s899_s19  }
  0x8e   : > { %880 = vsyncadd (%p1250_p0), [#allocation3], 4294967280  ;;  %s582_s10 = sshll.u32 %s1152_s24, 3  ;;  %s254_s20 = scalar_lea.sflag [#allocation6], %s253_s0 }
  0x8f   : > { %s257_s12 = scalar_lea.vmem [#allocation5], %s582_s10  ;;  %p1251_p8 = scmp.ne.s32.totalorder %s1239_s6, 0 }
  0x91   : > { %882 = dma.done.wait (%p1251_p8), %s254_s20, 192  }
  0x92   : > { %884 = vsyncadd (%p1251_p8), %s254_s20, 4294967104  ;;  %s583_s9 = sshll.u32 %s1152_s24, 2  ;;  %p1252_p3 = pmov %p1250_p0 }
  0x93   : > { %s266_s27 = scalar_lea.vmem [#allocation7], %s583_s9 }
  0x94   : > { %886 = dma.done.wait (%p1252_p3), [#allocation9], 1024   ;;  %p1253_p2 = pmov %p1250_p0 }
  0x95   : > { %v304_v0 = vld [vmem:[%s257_s12] sm:$0xff]  ;;  %v586_v1 = vld [vmem:[%s1222_s3] ss:$0 sm:$0xff]  ;;  %v915_v4 = vmov 0.0   ;;  %v708_v7 = vld [vmem:[#allocation8 + $0x18] sm:$0xff]   ;;  %vm916_vm0 = vmmov 0  }
  0x96   : > { %888 = vsyncadd (%p1253_p2), [#allocation9], 4294966272  ;;  %v329_v2 = vmul.f32 %v586_v1, %v304_v0  ;;  %v705_v3 = vld [vmem:[#allocation8] sm:$0xff]   ;;  %609 = vmatprep.subr.bf16.mxu0 %v915_v4  ;;  %v706_v5 = vld [vmem:[#allocation8 + $0x8] sm:$0xff]   ;;  %625 = vmatprep.mubr.msk.bf16.mxu0 %vm916_vm0, %v915_v4  ;;  %s597_s6 = sshll.u32 %s1030_s29, 7  ;;  %s301_s28 = scalar_lea.vmem [#allocation10], %s582_s10 }
  0x97   : > { %610 = vmatpush3.bf16.msra.mxu0 %v705_v3  ;;  %v707_v6 = vld [vmem:[#allocation8 + $0x10] sm:$0xff]   ;;  %v587_v8 = vld [vmem:[#allocation2] ss:$0 sm:$0xff]  ;;  %v305_v10 = vld [vmem:[%s266_s27] sm:$0xf]  ;;  %s459_s30 = sshll.u32 %s301_s28, 4  ;;  %s1175_s23 = scalar_lea.hbm %s1224_s5, %s597_s6  ;;  %s1177_s30 = int_to_ptr.vmem [resolvable:$true] %s459_s30 }
  0x98   : > { %330 = vadd.xlane.f32.xlu0 %v329_v2  ;;  %611 = vmatprep.subr.bf16.mxu0 %v915_v4  ;;  %v341_v13 = vunpack.c.l.bf16 %v305_v10  ;;  %v709_v16 = vld [vmem:[#allocation8 + $0x20] sm:$0xff]   ;;  %v710_v17 = vld [vmem:[#allocation8 + $0x28] sm:$0xff]   ;;  %v711_v18 = vld [vmem:[#allocation8 + $0x30] sm:$0xff]   ;;  %s446_s29 = scalar_lea.sflag [#allocation4], %s1152_s24  ;;  %s833_s14 = scalar_lea.vmem %s1177_s30, 128 }
  0x99   : > { %v712_v19 = vld [vmem:[#allocation8 + $0x38] sm:$0xff]   ;;  %p834_p4 = scmp.ne.s32.totalorder %s1177_s30, %s833_s14  ;;  %p1254_p11 = scmp.ne.s32.totalorder %s1240_s7, 0 }
  0x9a   : > { %s917_s11 = smov [#allocation10]  }
  0x9b   : > { %612 = vmatpush3.bf16.msra.mxu0 %v706_v5  ;;  %p835_p13 = pnand %p834_p4, %p1254_p11  ;;  %s837_s16 = sshll.u32 %s917_s11, 4  ;;  %s838_s16 = int_to_ptr.vmem [resolvable:$false] %s837_s16 }
  0x9c   : > { %613 = vmatprep.subr.bf16.mxu0 %v915_v4  ;;  %s839_s17 = scalar_lea.vmem %s838_s16, 256  ;;  %p840_p10 = scmp.lt.s32.totalorder %s1177_s30, %s838_s16 }
  0x9d   : > { %p836_p1 = pneg %p835_p13  ;;  %p841_p5 = scmp.lt.s32.totalorder %s839_s17, %s833_s14 }
  0x9f   : > { %614 = vmatpush3.bf16.msra.mxu0 %v707_v6  ;;  %p842_p7 = por %p841_p5, %p840_p10 }
  0xa0   : > { %615 = vmatprep.subr.bf16.mxu0 %v915_v4 }
  0xa1   : > { %p843_p9 = pnand %p842_p7, %p836_p1 }
  0xa3   : > { %616 = vmatpush3.bf16.msra.mxu0 %v708_v7 }
  0xa4   : > { %617 = vmatprep.subr.bf16.mxu0 %v915_v4 }
  0xa7   : > { %618 = vmatpush3.bf16.msra.mxu0 %v709_v16 }
  0xa8   : > { %619 = vmatprep.subr.bf16.mxu0 %v915_v4 }
  0xab   : > { %620 = vmatpush3.bf16.msra.mxu0 %v710_v17 }
  0xac   : > { %621 = vmatprep.subr.bf16.mxu0 %v915_v4 }
  0xaf   : > { %622 = vmatpush3.bf16.msra.mxu0 %v711_v18 }
  0xb0   : > { %623 = vmatprep.subr.bf16.mxu0 %v915_v4 }
  0xb3   : > { %624 = vmatpush3.bf16.msra.mxu0 %v712_v19 }
 0x125   : > { %v331_v9 = vpop.xlane.xlu0 %330 }
 0x126   : > { %v338_v11 = vadd.f32 %v587_v8, %v331_v9 }
 0x128   : > { %v339_v12 = vmul.f32 0.01, %v338_v11 }
 0x12a   : > { %v340_v14 = vmax.f32 %v338_v11, %v339_v12 }
 0x12c   : > { %v342_v15 = vadd.f32 %v341_v13, %v340_v14 }
 0x12e   : > { %343 = vmax.xlane.f32.xlu0 %v342_v15 }
 0x1bb   : > { %v344_v20 = vpop.xlane.xlu0 %343 }
 0x1bc   : > { %v345_v21 = vsub.f32 %v342_v15, %v344_v20  ;;  %vm439_vm1 = vcmp.gt.f32.partialorder %v344_v20, -1e+29 }
 0x1be   : > { %v346_v22 = vmul.f32 1.442695, %v345_v21 }
 0x1c0   : > { %713 = vpow2.f32 %v346_v22 }
 0x1ca   : > { %v714_v23 = vpop.eup %713 }
 0x1cb   : > { %348 = vadd.xlane.f32.xlu1 %v714_v23  ;;  %v350_v24 = vpack.c.bf16 %v714_v23, %v714_v23 }
 0x1cd   : > { %626 = vmatmul.mubr.bf16.vlgmr.msra.gmra.mrb[0].mxu0 %v350_v24 }
 0x258   : > { %v349_v25 = vpop.xlane.xlu1 %348 }
 0x259   : > { %715 = vrcp.f32 %v349_v25 }
 0x263   : > { %v716_v26 = vpop.eup %715 }
 0x264   : > { %v442_v28 = vsel %vm439_vm1, %v716_v26, 0.0 }
 0x2a0   : > { %v433_v27 = vpop.f32.mrb[0].mxu0 }
 0x2a1   : > { %v443_v29 = vmul.f32 %v442_v28, %v433_v27  ;;  %v627_v30 = vpop.f32.mrb[1].mxu0 }
 0x2a2   : > { %v436_v31 = vpop.f32.mrb[2].mxu0 }
 0x2a3   : > { %444 = vst [vmem:[%s301_s28] sm:$0xff] %v443_v29  ;;  %v628_v32 = vpop.f32.mrb[3].mxu0 }
 0x2a4   : > { %846 = shalt.err (!%p843_p9)
}
 0x2a5   : > { %s847_s1 = scalar_lea.hbm %s1175_s23, 128  ;;  %s851_s10 = scalar_lea.hbm %s1224_s5, 256 }
 0x2a6   : > { %p848_p6 = scmp.ne.s32.totalorder %s1175_s23, %s847_s1  ;;  %p852_p8 = scmp.lt.u32.totalorder %s1175_s23, %s1224_s5 }
 0x2a7   : > { %p853_p3 = scmp.lt.u32.totalorder %s851_s10, %s847_s1  ;;  %p855_p4 = scmp.lt.u32.totalorder %s847_s1, %s1175_s23 }
 0x2a8   : > { %p849_p12 = pnand %p848_p6, %p1254_p11 }
 0x2a9   : > { %p854_p2 = por %p853_p3, %p852_p8 }
 0x2aa   : > { %p850_p0 = pneg %p849_p12 }
 0x2ab   : > { %p856_p13 = por %p855_p4, %p854_p2 }
 0x2ad   : > { %p857_p1 = pnand %p856_p13, %p850_p0 }
 0x2af   : > { %860 = shalt.err (!%p857_p1)
}
 0x2b0   : > { %641 = dma.vmem_to_hbm [thread:$0]  (%p1254_p11), %s1177_s30, 128, %s1175_s23, %s446_s29  }
 0x2b1 PF: > { %s471_s9 = sand.u32 1, %s895_s18   ;;  %p1255_p10 = scmp.ne.s32.totalorder %s1241_s8, 0 }
 0x2b2   : > { %p1256_p5 = scmp.ge.s32.totalorder %s907_s21, 2  ;;  %s472_s27 = scalar_lea.sflag [#allocation4], %s471_s9 }
 0x2b4   : > { %p658_p7 = pnand %p1256_p5, %p1255_p10 }
 0x2b6   : > { %890 = dma.done.wait (!%p658_p7), %s472_s27, 128  }
 0x2b7   : > { %892 = vsyncadd (!%p658_p7), %s472_s27, 4294967168  ;;  %s1257_s25 = sld [smem:[#allocation15_spill]]  ;;  %s1258_s20 = sld [smem:[#allocation16_spill]] }
 0x2b8   : > { %p20_p9 = scmp.ge.s32.totalorder %s969_s22, 4   ;;  %s1259_s18 = smov %s899_s19 }
 0x2b9   : > { %s1261_s21 = smov %s969_s22 }
 0x2ba   :  { %22 = sbr.rel (!%p20_p9) target bundleno = 10 (0xa), region = 105 }
 0x2bd   : > { %s1260_s19 = smov %s1257_s25 }
 0x2c1   :  { %477 = vsyncpa [#allocation3], 1 }
 0x2c2   :  { %479 = vsyncpa [#allocation3 + $0x1], 1 }
 0x2c3   :  { %480 = vsyncpa [#allocation6], 1 }
 0x2c4   :  { %482 = vsyncpa [#allocation6 + $0x1], 1 }
 0x2c5   :  { %483 = vsyncpa [#allocation9], 1 }
 0x2c6   :  { %484 = vsyncpa [#allocation4], 1 }
 0x2c7   :  { %486 = vsyncpa [#allocation4 + $0x1], 1 }

</bundles_post_ra>
